<compile_context>
chip_gen: v7x
topology: tpu7x:2x2x1
jax: 0.10.0
libtpu: 0.0.40
codegen_flags: <defaults>
</compile_context>

<pallas_src>
import jax
import jax.numpy as jnp
from jax import lax
from jax.experimental import pallas as pl
from jax.experimental.pallas import tpu as pltpu


def _num_tensorcores_per_chip():
    """Best-effort TensorCore count per chip (v7x / v4 megacore = 2, else 1)."""
    try:
        kind = jax.devices()[0].device_kind.lower()
    except Exception:
        return 1
    if "v7" in kind or "7x" in kind or "v4" in kind:
        return 2
    return 1


def _pick_batch_tile(batch, n_cores):
    # v5e/v6e (1 TC): a single batch tile -> fewest grid steps, biggest DMA
    # chunks.  v7x (2 TCs): exactly two tiles on the leading 'parallel' axis.
    if n_cores >= 2 and batch % 2 == 0:
        return batch // 2
    return batch


def _pick_hw_tile(tb, chans, hw, itemsize, per_buffer_budget=8 << 20):
    """Lane tile for the streamed H*W axis.

    The tile is a power-of-two multiple of 128 (so the in-kernel lane fold can
    halve down to 128) and never larger than HW; it is sized so a single
    (tb, C, hw_tile) block -- including Mosaic's sublane padding of C up to the
    native tile height -- stays within `per_buffer_budget` (the BlockSpec
    double-buffers it, so ~2x that is resident).
    """
    if hw < 128:
        return hw  # full-extent block: one chunk, no masking, no fold needed
    sublane = 8 * max(1, 4 // itemsize)          # f32: 8, bf16: 16, int8: 32
    c_pad = -(-chans // sublane) * sublane       # sublane-padded channel count
    budget_lanes = max(128, per_buffer_budget // (tb * c_pad * itemsize))
    budget_lanes = min(budget_lanes, 32 * 1024)  # keep per-step vector values sane
    tile = 128
    while tile * 2 <= min(budget_lanes, hw):
        tile *= 2
    return tile


def _make_attention2d_kernel(hw_tile, hw_total, needs_mask):
    def _fold_lanes(v):
        # Pairwise-halve the lane axis down to 128 with aligned 128-lane
        # slices: pure VPU adds, no XLU in the hot loop (hw_tile = 128 * 2^k).
        width = v.shape[-1]
        while width > 128:
            half = width // 2
            v = v[..., :half] + v[..., half:]
            width = half
        return v

    def kernel(x_ref, w1_ref, w2_ref, b2_ref, o_ref, acc_ref):
        s = pl.program_id(1)
        n_hw = pl.num_programs(1)

        @pl.when(s == 0)
        def _init():
            acc_ref[...] = jnp.zeros_like(acc_ref)

        c = x_ref[...].astype(jnp.float32)              # (tb, C, hw_tile)

        if needs_mask:
            is_last = s == n_hw - 1

            @pl.when(jnp.logical_not(is_last))
            def _accumulate():
                acc_ref[...] += _fold_lanes(c)

            @pl.when(is_last)
            def _accumulate_tail():
                # Mask the ragged tail in-kernel instead of jnp.pad-ing x in
                # HBM (which would re-read/re-write the only large tensor).
                lane = lax.broadcasted_iota(jnp.int32, (1, 1, c.shape[-1]), 2)
                valid = (s * hw_tile + lane) < hw_total
                acc_ref[...] += _fold_lanes(jnp.where(valid, c, 0.0))
        else:
            acc_ref[...] += _fold_lanes(c)

        @pl.when(s == n_hw - 1)
        def _finalize():
            # Single cross-lane reduce per batch tile.  1/(H*W) is already
            # folded into w1 and 1/temperature into w2/b2 by the wrapper.
            pooled = jnp.sum(acc_ref[...], axis=-1)                     # (tb, C)
            w1 = w1_ref[...]                                            # (hidden, C)
            w2 = w2_ref[...]                                            # (K, hidden)
            b2 = b2_ref[...]                                            # (1, K)

            # fc1 (1x1 conv, no bias) + ReLU: dims are far below an MXU tile,
            # so VPU broadcast-multiplies + short lane reduces are used.
            h = jnp.sum(pooled[:, None, :] * w1[None, :, :], axis=-1)   # (tb, hidden)
            h = jnp.maximum(h, 0.0)

            # fc2 (1x1 conv) + bias.
            z = jnp.sum(h[:, None, :] * w2[None, :, :], axis=-1) + b2   # (tb, K)

            # Numerically stable, exactly normalized softmax over K.
            z = z - jnp.max(z, axis=-1, keepdims=True)
            e = jnp.exp(z)
            p = e / jnp.sum(e, axis=-1, keepdims=True)
            o_ref[...] = p[:, None, :].astype(o_ref.dtype)

    return kernel


def attention2d_pallas(x_nchw, fc1_w, fc2_w, fc2_b, temperature):
    """Forward pass of attention2d.

    x_nchw:  (B, C, H, W) float32 or bfloat16 (NCHW, like PyTorch).
    fc1_w:   (hidden, C)  -- nn.Conv2d(in_planes, hidden, 1).weight[..., 0, 0]
    fc2_w:   (K, hidden)  -- nn.Conv2d(hidden, K, 1).weight[..., 0, 0]
    fc2_b:   (K,)
    temperature: Python or traced scalar (folded into fc2 weights/bias).
    Returns: (B, K) float32 softmax attention weights.
    """
    B, C, H, W = x_nchw.shape
    hidden, c_in = fc1_w.shape
    K, hidden2 = fc2_w.shape
    assert c_in == C and hidden2 == hidden

    HW = H * W
    inv_t = 1.0 / jnp.asarray(temperature, jnp.float32)
    w1 = fc1_w.astype(jnp.float32) * (1.0 / HW)           # fold mean into fc1
    w2 = fc2_w.astype(jnp.float32) * inv_t                # fold 1/T into fc2
    b2 = (fc2_b.astype(jnp.float32) * inv_t).reshape(1, K)

    itemsize = x_nchw.dtype.itemsize
    tb = _pick_batch_tile(B, _num_tensorcores_per_chip())
    hw_tile = _pick_hw_tile(tb, C, HW, itemsize)
    n_hw = pl.cdiv(HW, hw_tile)
    needs_mask = (HW % hw_tile) != 0
    acc_lanes = min(128, hw_tile)

    x_flat = x_nchw.reshape(B, C, HW)   # free: NCHW is already (B, C, H*W) contiguous
    grid = (B // tb, n_hw)

    kernel = _make_attention2d_kernel(hw_tile, HW, needs_mask)

    out3 = pl.pallas_call(
        kernel,
        out_shape=jax.ShapeDtypeStruct((B, 1, K), jnp.float32),
        grid_spec=pltpu.PrefetchScalarGridSpec(
            num_scalar_prefetch=0,
            grid=grid,
            in_specs=[
                pl.BlockSpec((tb, C, hw_tile), lambda b, s: (b, 0, s)),
                pl.BlockSpec((hidden, C), lambda b, s: (0, 0)),
                pl.BlockSpec((K, hidden), lambda b, s: (0, 0)),
                pl.BlockSpec((1, K), lambda b, s: (0, 0)),
            ],
            out_specs=pl.BlockSpec((tb, 1, K), lambda b, s: (b, 0, 0)),
            scratch_shapes=[pltpu.VMEM((tb, C, acc_lanes), jnp.float32)],
        ),
        compiler_params=pltpu.CompilerParams(
            dimension_semantics=("parallel", "arbitrary"),
            vmem_limit_bytes=32 * 1024 * 1024,
        ),
        cost_estimate=pl.CostEstimate(
            flops=2 * B * C * HW,
            transcendentals=B * K,
            bytes_accessed=x_nchw.size * itemsize
            + (B * K + C * hidden + K * hidden + K) * 4,
        ),
    )(x_flat, w1, w2, b2)
    return out3.reshape(B, K)


def _reference_jax(x_nchw, fc1_w, fc2_w, fc2_b, temperature):
    pooled = jnp.mean(x_nchw.astype(jnp.float32), axis=(2, 3))
    h = jnp.maximum(pooled @ fc1_w.T, 0.0)
    logits = h @ fc2_w.T + fc2_b[None, :]
    return jax.nn.softmax(logits / temperature, axis=1)


if __name__ == "__main__":
    # Module config: attention2d(in_planes=4, ratios=0.25, K=4, temperature=4).
    in_planes, ratios, K, temperature = 4, 0.25, 4, 4       # temperature % 3 == 1
    hidden_planes = int(in_planes * ratios) + 1 if in_planes != 3 else K  # = 2

    key = jax.random.PRNGKey(0)
    kx, k1, k2, kx2, kx3 = jax.random.split(key, 5)

    B, H, W = 2, 16, 16
    x = jax.random.normal(kx, (B, in_planes, H, W), dtype=jnp.float32)

    # Deterministic kaiming_normal_(mode='fan_out', nonlinearity='relu') init
    # for the 1x1 convs (fan_out = out_channels for a 1x1 conv), zero bias.
    w1 = jax.random.normal(k1, (hidden_planes, in_planes), jnp.float32) * (2.0 / hidden_planes) ** 0.5
    w2 = jax.random.normal(k2, (K, hidden_planes), jnp.float32) * (2.0 / K) ** 0.5
    b2 = jnp.zeros((K,), jnp.float32)

    out = jax.block_until_ready(attention2d_pallas(x, w1, w2, b2, temperature))
    ref = _reference_jax(x, w1, w2, b2, temperature)
    assert out.shape == (B, K)
    assert jnp.allclose(jnp.sum(out, axis=1), 1.0, atol=1e-4)
    assert jnp.allclose(out, ref, atol=1e-4, rtol=1e-4)

    # Larger spatial map: multiple H*W chunks per batch tile with a masked
    # ragged tail (HW = 5120, hw_tile = 4096).
    x_big = jax.random.normal(kx2, (B, in_planes, 64, 80), dtype=jnp.float32)
    out_big = jax.block_until_ready(attention2d_pallas(x_big, w1, w2, b2, temperature))
    ref_big = _reference_jax(x_big, w1, w2, b2, temperature)
    assert jnp.allclose(out_big, ref_big, atol=1e-4, rtol=1e-4)

    # Very ragged spatial map (HW = 1320) to stress the in-kernel tail mask.
    x_rag = jax.random.normal(kx3, (B, in_planes, 40, 33), dtype=jnp.float32)
    out_rag = jax.block_until_ready(attention2d_pallas(x_rag, w1, w2, b2, temperature))
    ref_rag = _reference_jax(x_rag, w1, w2, b2, temperature)
    assert jnp.allclose(out_rag, ref_rag, atol=1e-4, rtol=1e-4)

    print("KERNEL_OK")
</pallas_src>

<mosaic_0001>
module attributes {stable_mosaic.version = 11 : i64} {
  func.func @kernel(%arg0: i32, %arg1: i32, %arg2: memref<2x4x256xf32, #tpu.memory_space<vmem>>, %arg3: memref<2x4xf32, #tpu.memory_space<vmem>>, %arg4: memref<4x2xf32, #tpu.memory_space<vmem>>, %arg5: memref<1x4xf32, #tpu.memory_space<vmem>>, %arg6: memref<2x1x4xf32, #tpu.memory_space<vmem>>, %arg7: memref<2x4x128xf32, #tpu.memory_space<vmem>>) attributes {dimension_semantics = [#tpu.dimension_semantics<parallel>, #tpu.dimension_semantics<arbitrary>], iteration_bounds = array<i64: 1, 1>, scalar_prefetch = 0 : i64, scratch_operands = 1 : i64, tpu.core_type = #tpu.core_type<tc>, window_params = [{transform_indices = @transform_0, window_bounds = array<i64: 2, 4, 256>}, {pipeline_mode = #tpu.pipeline_mode<synchronous>, transform_indices = @transform_1, window_bounds = array<i64: 2, 4>}, {pipeline_mode = #tpu.pipeline_mode<synchronous>, transform_indices = @transform_2, window_bounds = array<i64: 4, 2>}, {pipeline_mode = #tpu.pipeline_mode<synchronous>, transform_indices = @transform_3, window_bounds = array<i64: 1, 4>}, {transform_indices = @transform_4, window_bounds = array<i64: 2, 1, 4>}]} {
    %c0_i32 = arith.constant 0 : i32
    %0 = arith.cmpi eq, %arg1, %c0_i32 : i32
    %1 = arith.extui %0 : i1 to i32
    %c0_i32_0 = arith.constant 0 : i32
    %2 = arith.cmpi ne, %1, %c0_i32_0 : i32
    scf.if %2 {
      %cst = arith.constant 0.000000e+00 : f32
      %13 = vector.broadcast %cst : f32 to vector<2x4x128xf32>
      %c0_11 = arith.constant 0 : index
      %c0_12 = arith.constant 0 : index
      %c0_13 = arith.constant 0 : index
      %14 = vector.load %arg7[%c0_11, %c0_12, %c0_13] : memref<2x4x128xf32, #tpu.memory_space<vmem>>, vector<2x4x128xf32>
      tpu.vector_store %arg7[%c0_11, %c0_12, %c0_13], %13 {strides = array<i32>} : memref<2x4x128xf32, #tpu.memory_space<vmem>>, vector<2x4x128xf32>,
    } else {
    }
    %c0 = arith.constant 0 : index
    %c0_1 = arith.constant 0 : index
    %c0_2 = arith.constant 0 : index
    %3 = vector.load %arg2[%c0, %c0_1, %c0_2] : memref<2x4x256xf32, #tpu.memory_space<vmem>>, vector<2x4x256xf32>
    %c0_3 = arith.constant 0 : index
    %c0_4 = arith.constant 0 : index
    %c0_5 = arith.constant 0 : index
    %4 = vector.load %arg7[%c0_3, %c0_4, %c0_5] : memref<2x4x128xf32, #tpu.memory_space<vmem>>, vector<2x4x128xf32>
    %5 = vector.extract_strided_slice %3 {offsets = [0, 0, 0], sizes = [2, 4, 128], strides = [1, 1, 1]} : vector<2x4x256xf32> to vector<2x4x128xf32>
    %6 = vector.extract_strided_slice %3 {offsets = [0, 0, 128], sizes = [2, 4, 128], strides = [1, 1, 1]} : vector<2x4x256xf32> to vector<2x4x128xf32>
    %7 = arith.addf %5, %6 : vector<2x4x128xf32>
    %8 = arith.addf %4, %7 : vector<2x4x128xf32>
    %c0_6 = arith.constant 0 : index
    %c0_7 = arith.constant 0 : index
    %c0_8 = arith.constant 0 : index
    %9 = vector.load %arg7[%c0_6, %c0_7, %c0_8] : memref<2x4x128xf32, #tpu.memory_space<vmem>>, vector<2x4x128xf32>
    tpu.vector_store %arg7[%c0_6, %c0_7, %c0_8], %8 {strides = array<i32>} : memref<2x4x128xf32, #tpu.memory_space<vmem>>, vector<2x4x128xf32>,
    %c0_i32_9 = arith.constant 0 : i32
    %10 = arith.cmpi eq, %arg1, %c0_i32_9 : i32
    %11 = arith.extui %10 : i1 to i32
    %c0_i32_10 = arith.constant 0 : i32
    %12 = arith.cmpi ne, %11, %c0_i32_10 : i32
    scf.if %12 {
      %c0_11 = arith.constant 0 : index
      %c0_12 = arith.constant 0 : index
      %c0_13 = arith.constant 0 : index
      %13 = vector.load %arg7[%c0_11, %c0_12, %c0_13] : memref<2x4x128xf32, #tpu.memory_space<vmem>>, vector<2x4x128xf32>
      %cst = arith.constant dense<0.000000e+00> : vector<2x4xf32>
      %14 = vector.multi_reduction <add>, %13, %cst [2] : vector<2x4x128xf32> to vector<2x4xf32>
      %c0_14 = arith.constant 0 : index
      %c0_15 = arith.constant 0 : index
      %15 = vector.load %arg3[%c0_14, %c0_15] : memref<2x4xf32, #tpu.memory_space<vmem>>, vector<2x4xf32>
      %c0_16 = arith.constant 0 : index
      %c0_17 = arith.constant 0 : index
      %16 = vector.load %arg4[%c0_16, %c0_17] : memref<4x2xf32, #tpu.memory_space<vmem>>, vector<4x2xf32>
      %c0_18 = arith.constant 0 : index
      %c0_19 = arith.constant 0 : index
      %17 = vector.load %arg5[%c0_18, %c0_19] : memref<1x4xf32, #tpu.memory_space<vmem>>, vector<1x4xf32>
      %18 = vector.shape_cast %14 : vector<2x4xf32> to vector<2x1x4xf32>
      %19 = vector.shape_cast %15 : vector<2x4xf32> to vector<1x2x4xf32>
      %20 = vector.broadcast %18 : vector<2x1x4xf32> to vector<2x2x4xf32>
      %21 = vector.broadcast %19 : vector<1x2x4xf32> to vector<2x2x4xf32>
      %22 = arith.mulf %20, %21 : vector<2x2x4xf32>
      %cst_20 = arith.constant dense<0.000000e+00> : vector<2x2xf32>
      %23 = vector.multi_reduction <add>, %22, %cst_20 [2] : vector<2x2x4xf32> to vector<2x2xf32>
      %cst_21 = arith.constant 0.000000e+00 : f32
      %24 = vector.broadcast %cst_21 : f32 to vector<2x2xf32>
      %25 = arith.maximumf %23, %24 : vector<2x2xf32>
      %26 = vector.shape_cast %25 : vector<2x2xf32> to vector<2x1x2xf32>
      %27 = vector.shape_cast %16 : vector<4x2xf32> to vector<1x4x2xf32>
      %28 = vector.broadcast %26 : vector<2x1x2xf32> to vector<2x4x2xf32>
      %29 = vector.broadcast %27 : vector<1x4x2xf32> to vector<2x4x2xf32>
      %30 = arith.mulf %28, %29 : vector<2x4x2xf32>
      %cst_22 = arith.constant dense<0.000000e+00> : vector<2x4xf32>
      %31 = vector.multi_reduction <add>, %30, %cst_22 [2] : vector<2x4x2xf32> to vector<2x4xf32>
      %32 = vector.broadcast %17 : vector<1x4xf32> to vector<2x4xf32>
      %33 = arith.addf %31, %32 : vector<2x4xf32>
      %cst_23 = arith.constant dense<0xFF800000> : vector<2xf32>
      %34 = vector.multi_reduction <maximumf>, %33, %cst_23 [1] : vector<2x4xf32> to vector<2xf32>
      %35 = vector.shape_cast %34 : vector<2xf32> to vector<2x1xf32>
      %36 = vector.broadcast %35 : vector<2x1xf32> to vector<2x4xf32>
      %37 = arith.subf %33, %36 : vector<2x4xf32>
      %38 = math.exp %37 : vector<2x4xf32>
      %cst_24 = arith.constant dense<0.000000e+00> : vector<2xf32>
      %39 = vector.multi_reduction <add>, %38, %cst_24 [1] : vector<2x4xf32> to vector<2xf32>
      %40 = vector.shape_cast %39 : vector<2xf32> to vector<2x1xf32>
      %41 = vector.broadcast %40 : vector<2x1xf32> to vector<2x4xf32>
      %42 = arith.divf %38, %41 : vector<2x4xf32>
      %43 = vector.shape_cast %42 : vector<2x4xf32> to vector<2x1x4xf32>
      %c0_25 = arith.constant 0 : index
      %c0_26 = arith.constant 0 : index
      %c0_27 = arith.constant 0 : index
      %44 = vector.load %arg6[%c0_25, %c0_26, %c0_27] : memref<2x1x4xf32, #tpu.memory_space<vmem>>, vector<2x1x4xf32>
      tpu.vector_store %arg6[%c0_25, %c0_26, %c0_27], %43 {strides = array<i32>} : memref<2x1x4xf32, #tpu.memory_space<vmem>>, vector<2x1x4xf32>,
    } else {
    }
    return
  }
  func.func @transform_0(%arg0: i32, %arg1: i32) -> (i32, i32, i32) {
    %c0_i32 = arith.constant 0 : i32
    %c0_i32_0 = arith.constant 0 : i32
    return %arg0, %c0_i32, %arg1 : i32, i32, i32
  }
  func.func @transform_1(%arg0: i32, %arg1: i32) -> (i32, i32) {
    %c0_i32 = arith.constant 0 : i32
    %c0_i32_0 = arith.constant 0 : i32
    %c0_i32_1 = arith.constant 0 : i32
    return %c0_i32, %c0_i32_0 : i32, i32
  }
  func.func @transform_2(%arg0: i32, %arg1: i32) -> (i32, i32) {
    %c0_i32 = arith.constant 0 : i32
    %c0_i32_0 = arith.constant 0 : i32
    %c0_i32_1 = arith.constant 0 : i32
    return %c0_i32, %c0_i32_0 : i32, i32
  }
  func.func @transform_3(%arg0: i32, %arg1: i32) -> (i32, i32) {
    %c0_i32 = arith.constant 0 : i32
    %c0_i32_0 = arith.constant 0 : i32
    %c0_i32_1 = arith.constant 0 : i32
    return %c0_i32, %c0_i32_0 : i32, i32
  }
  func.func @transform_4(%arg0: i32, %arg1: i32) -> (i32, i32, i32) {
    %c0_i32 = arith.constant 0 : i32
    %c0_i32_0 = arith.constant 0 : i32
    %c0_i32_1 = arith.constant 0 : i32
    return %arg0, %c0_i32, %c0_i32_0 : i32, i32, i32
  }
}

</mosaic_0001>

<bundles_post_ra>
// kernel: tpu_custom_call.1
= control target key start
LH: loop header
LB: loop body
LE: loop exit
PB: predicated region body
PF: predicated region fallthrough
CT: control target
= control target key end

     0   :  { %9 = vsyncpa [#allocation4], 0  ;;  %s569_s0 = inlined_call_operand.hbm [shape: f32[2,4,256], index: 0, kind: input, shape index: {}]   ;;  %s570_s1 = inlined_call_operand.vmem [shape: f32[2,4], index: 1, kind: input, shape index: {}]   ;;  %s571_s2 = inlined_call_operand.vmem [shape: f32[4,2], index: 2, kind: input, shape index: {}]   ;;  %s572_s3 = inlined_call_operand.vmem [shape: f32[1,4], index: 3, kind: input, shape index: {}]   ;;  %s573_s4 = inlined_call_operand.hbm [shape: f32[2,1,4], index: 4, kind: output, shape index: {}]  }
   0x1   :  { %10 = vsyncpa [#allocation5], 0  ;;  %s450_s15 = smov [#allocation3]   ;;  %s402_s19 = scalar_lea.hbm %s569_s0, 256 }
   0x2   :  { %s16_s16 = sshll.u32 %s450_s15, 4  ;;  %p403_p0 = scmp.ne.s32.totalorder %s569_s0, %s402_s19  ;;  %s17_s16 = int_to_ptr.vmem [resolvable:$true] %s16_s16 }
   0x3   :  { %p406_p1 = scmp.lt.u32.totalorder %s402_s19, %s569_s0 }
   0x5   :  { %p408_p2 = pnand %p406_p1, %p403_p0 }
   0x7   :  { %411 = shalt.err (!%p408_p2)
}
   0x8   :  { %s412_s24 = scalar_lea.vmem %s17_s16, 256  ;;  %p417_p4 = scmp.lt.s32.totalorder %s17_s16, %s17_s16 }
   0x9   :  { %p413_p3 = scmp.ne.s32.totalorder %s17_s16, %s412_s24  ;;  %p418_p5 = scmp.lt.s32.totalorder %s412_s24, %s412_s24 }
   0xb   :  { %p419_p6 = por %p418_p5, %p417_p4 }
   0xd   :  { %p420_p7 = pnand %p419_p6, %p413_p3 }
   0xf   :  { %423 = shalt.err (!%p420_p7)
}
  0x10   :  { %s451_s25 = smov 128   ;;  %s452_s26 = smov 8  }
  0x11   :  { %22 = dma.hbm_to_vmem [thread:$0]  %s569_s0, 256, %s17_s16, [#allocation4], %s451_s25, %s451_s25, %s452_s26  }
  0x12   :  { %446 = dma.done.wait [#allocation4], 256  }
  0x13   :  { %447 = vsyncadd [#allocation4], 4294967040  ;;  %v70_v0 = vlaneseq  ;;  %v453_v1 = vmov 0.0   ;;  %v38_v5 = vld [vmem:[#allocation3] sm:$0xff]  ;;  %v39_v6 = vld [vmem:[#allocation3 + $0x8] sm:$0xff]  ;;  %vm59_vm0 = vcmask 1043456  }
  0x14   :  { %36 = vst [vmem:[#allocation2] sm:$0xf] %v453_v1  ;;  %37 = vst [vmem:[#allocation2 + $0x4] sm:$0xf] %v453_v1  ;;  %v66_v7 = vld [vmem:[%s570_s1] sm:$0x3] }
  0x15   :  { %v495_v2 = vshrl.u32 %v70_v0, 7  ;;  %v44_v8 = vrot.slane %v38_v5, 4  ;;  %v45_v9 = vrot.slane %v39_v6, 4  ;;  %v454_v22 = vmov 0   ;;  %v67_v45 = vld [vmem:[%s571_s2] sm:$0xf] }
  0x16   :  { %393 = vset.pattern.permute.xlu1 %v454_v22  ;;  %392 = vset.pattern.permute.xlu0 %v454_v22  ;;  %v107_v31 = vand.u32 127, %v70_v0  ;;  %vm124_vm1 = vcmask 1041409   ;;  %vm129_vm2 = vcmask 25600   ;;  %vm244_vm3 = vcmask 1042434  }
  0x17   :  { %v498_v3 = vsub.s32 0, %v495_v2  ;;  %v501_v4 = vsub.s32 1, %v495_v2  ;;  %v48_v13 = vadd.f32 %v44_v8, %v38_v5  ;;  %v49_v14 = vadd.f32 %v45_v9, %v39_v6 }
  0x18   :  { %v509_v32 = vsub.s32 %v107_v31, %v495_v2  ;;  %v155_v48 = vsub.s32 2, %v495_v2  ;;  %v162_v50 = vsub.s32 3, %v495_v2  ;;  %vm246_vm4 = vcmask 1043459  }
  0x19   :  { %v73_v10 = vrot.slane %v66_v7, %v498_v3  ;;  %v80_v15 = vrot.slane %v66_v7, %v501_v4  ;;  %v142_v46 = vrot.slane %v67_v45, %v498_v3  ;;  %v149_v47 = vrot.slane %v67_v45, %v501_v4 }
  0x1a   :  { %v156_v49 = vrot.slane %v67_v45, %v155_v48  ;;  %v163_v51 = vrot.slane %v67_v45, %v162_v50  ;;  %vm253_vm5 = vcmask 11264   ;;  %vm363_vm6 = vcmask 24576  }
  0x1b   :  { %v40_v11 = vld [vmem:[#allocation2] sm:$0xf]  ;;  %v41_v12 = vld [vmem:[#allocation2 + $0x4] sm:$0xf]  ;;  %75 = vbcast.lane.b32.xlu1 %v73_v10, 256 }
  0x1c   :  { %v50_v16 = vadd.f32 %v48_v13, %v40_v11  ;;  %v51_v17 = vadd.f32 %v49_v14, %v41_v12 }
  0x1e   :  { %52 = vst [vmem:[#allocation2] sm:$0xf] %v50_v16  ;;  %53 = vst [vmem:[#allocation2 + $0x4] sm:$0xf] %v51_v17 }
  0x1f   :  { %82 = vbcast.lane.b32.xlu1 %v80_v15, 256 }
  0x25   :  { %v57_v18 = vld [vmem:[#allocation2] sm:$0xf]  ;;  %v58_v19 = vld [vmem:[#allocation2 + $0x4] sm:$0xf] }
  0x26   :  { %v60_v20 = vsel %vm59_vm0, %v57_v18, 0.0  ;;  %v63_v21 = vsel %vm59_vm0, %v58_v19, 0.0 }
  0x27   :  { %61 = vadd.xlane.f32.xlu0 %v60_v20 }
  0x2b   :  { %64 = vadd.xlane.f32.xlu0 %v63_v21 }
  0x8d   :  { %v76_v23 = vpop.permute.xlu1 %75 }
  0x91   :  { %v83_v24 = vpop.permute.xlu1 %82 }
  0xb4   :  { %v62_v25 = vpop.xlane.xlu0 %61 }
  0xb5   :  { %v86_v26 = vmul.f32 %v76_v23, %v62_v25  ;;  %v87_v27 = vmul.f32 %v83_v24, %v62_v25 }
  0xb7   :  { %98 = vperm.xlu1 %393, %v87_v27   ;;  %95 = vperm.xlu0 %392, %v86_v26  }
  0xb8   :  { %v65_v28 = vpop.xlane.xlu0 %64 }
  0xb9   :  { %v88_v29 = vmul.f32 %v76_v23, %v65_v28  ;;  %v89_v30 = vmul.f32 %v83_v24, %v65_v28 }
  0xbb   :  { %101 = vperm.xlu1 %393, %v88_v29  }
  0xbf   :  { %104 = vperm.xlu1 %393, %v89_v30   ;;  %v383_v30 = vld [vmem:[%s572_s3] ss:$0 sm:$0xff]  ;;  %s455_s3 = smov [#allocation6]  }
  0xc0   :  { %s371_s6 = sshll.u32 %s455_s3, 4  ;;  %s372_s6 = int_to_ptr.vmem [resolvable:$true] %s371_s6 }
  0xc1   :  { %s424_s7 = scalar_lea.vmem %s372_s6, 32  ;;  %p429_p9 = scmp.lt.s32.totalorder %s372_s6, %s372_s6 }
  0xc2   :  { %p425_p8 = scmp.ne.s32.totalorder %s372_s6, %s424_s7  ;;  %p430_p10 = scmp.lt.s32.totalorder %s424_s7, %s424_s7 }
  0xc4   :  { %p431_p11 = por %p430_p10, %p429_p9 }
  0xc6   :  { %p432_p12 = pnand %p431_p11, %p425_p8 }
 0x136   :  { %v99_v33 = vpop.permute.xlu1 %98  ;;  %v96_v34 = vpop.permute.xlu0 %95 }
 0x137   :  { %v115_v35 = vrot.slane %v99_v33, %v509_v32  ;;  %v111_v36 = vrot.slane %v96_v34, %v509_v32 }
 0x139   :  { %v125_v37 = vsel %vm124_vm1, %v115_v35, %v111_v36 }
 0x13a   :  { %v102_v38 = vpop.permute.xlu1 %101  ;;  %v130_v39 = vsel %vm129_vm2, %v125_v37, 0.0 }
 0x13b   :  { %131 = vadd.xlane.f32.xlu1 %v130_v39  ;;  %v119_v41 = vrot.slane %v102_v38, %v509_v32 }
 0x13e   :  { %v105_v40 = vpop.permute.xlu1 %104 }
 0x13f   :  { %v123_v42 = vrot.slane %v105_v40, %v509_v32 }
 0x141   :  { %v126_v43 = vsel %vm124_vm1, %v123_v42, %v119_v41 }
 0x142   :  { %v133_v44 = vsel %vm129_vm2, %v126_v43, 0.0 }
 0x143   :  { %134 = vadd.xlane.f32.xlu0 %v133_v44 }
 0x14c   :  { %144 = vbcast.lane.b32.xlu1 %v142_v46, 256 }
 0x150   :  { %151 = vbcast.lane.b32.xlu1 %v149_v47, 256 }
 0x154   :  { %158 = vbcast.lane.b32.xlu1 %v156_v49, 256 }
 0x158   :  { %165 = vbcast.lane.b32.xlu1 %v163_v51, 256 }
 0x1c8   :  { %v132_v52 = vpop.xlane.xlu1 %131 }
 0x1c9   :  { %v136_v53 = vmax.f32 %v132_v52, 0.0 }
 0x1cc   :  { %v145_v54 = vpop.permute.xlu1 %144 }
 0x1cd   :  { %v171_v55 = vmul.f32 %v145_v54, %v136_v53 }
 0x1cf   :  { %188 = vperm.xlu0 %392, %v171_v55  }
 0x1d0   :  { %v152_v56 = vpop.permute.xlu1 %151  ;;  %v135_v57 = vpop.xlane.xlu0 %134 }
 0x1d1   :  { %v172_v58 = vmul.f32 %v152_v56, %v136_v53  ;;  %v137_v59 = vmax.f32 %v135_v57, 0.0 }
 0x1d3   :  { %191 = vperm.xlu1 %393, %v172_v58   ;;  %v175_v61 = vmul.f32 %v145_v54, %v137_v59  ;;  %v176_v0 = vmul.f32 %v152_v56, %v137_v59 }
 0x1d4   :  { %v159_v60 = vpop.permute.xlu1 %158 }
 0x1d5   :  { %v173_v1 = vmul.f32 %v159_v60, %v136_v53  ;;  %v177_v2 = vmul.f32 %v159_v60, %v137_v59 }
 0x1d7   :  { %200 = vperm.xlu1 %393, %v175_v61  }
 0x1d8   :  { %v166_v62 = vpop.permute.xlu1 %165 }
 0x1d9   :  { %v174_v63 = vmul.f32 %v166_v62, %v136_v53  ;;  %v178_v5 = vmul.f32 %v166_v62, %v137_v59 }
 0x1db   :  { %197 = vperm.xlu0 %392, %v174_v63   ;;  %203 = vperm.xlu1 %393, %v176_v0  }
 0x1df   :  { %194 = vperm.xlu1 %393, %v173_v1  }
 0x1e3   :  { %206 = vperm.xlu1 %393, %v177_v2  }
 0x1e7   :  { %209 = vperm.xlu1 %393, %v178_v5  }
 0x24e   :  { %v189_v8 = vpop.permute.xlu0 %188 }
 0x24f   :  { %v214_v12 = vrot.slane %v189_v8, %v509_v32 }
 0x252   :  { %v192_v6 = vpop.permute.xlu1 %191 }
 0x253   :  { %v218_v10 = vrot.slane %v192_v6, %v509_v32 }
 0x255   :  { %v243_v15 = vsel %vm124_vm1, %v218_v10, %v214_v12 }
 0x256   :  { %v201_v7 = vpop.permute.xlu1 %200 }
 0x257   :  { %v230_v23 = vrot.slane %v201_v7, %v509_v32 }
 0x25a   :  { %v204_v9 = vpop.permute.xlu1 %203  ;;  %v198_v11 = vpop.permute.xlu0 %197 }
 0x25b   :  { %v226_v16 = vrot.slane %v198_v11, %v509_v32  ;;  %v234_v20 = vrot.slane %v204_v9, %v509_v32 }
 0x25d   :  { %v248_v25 = vsel %vm124_vm1, %v234_v20, %v230_v23 }
 0x25e   :  { %v195_v13 = vpop.permute.xlu1 %194 }
 0x25f   :  { %v222_v14 = vrot.slane %v195_v13, %v509_v32 }
 0x261   :  { %v245_v17 = vsel %vm244_vm3, %v222_v14, %v243_v15 }
 0x262   :  { %v207_v18 = vpop.permute.xlu1 %206  ;;  %v247_v19 = vsel %vm246_vm4, %v226_v16, %v245_v17 }
 0x263   :  { %v254_v21 = vsel %vm253_vm5, %v247_v19, 0.0  ;;  %v238_v22 = vrot.slane %v207_v18, %v509_v32 }
 0x264   :  { %255 = vadd.xlane.f32.xlu0 %v254_v21 }
 0x265   :  { %v249_v27 = vsel %vm244_vm3, %v238_v22, %v248_v25 }
 0x266   :  { %v210_v24 = vpop.permute.xlu1 %209 }
 0x267   :  { %v242_v26 = vrot.slane %v210_v24, %v509_v32 }
 0x269   :  { %v250_v28 = vsel %vm246_vm4, %v242_v26, %v249_v27 }
 0x26a   :  { %v257_v29 = vsel %vm253_vm5, %v250_v28, 0.0 }
 0x26b   :  { %258 = vadd.xlane.f32.xlu1 %v257_v29 }
 0x27a   :  { %266 = vbcast.lane.b32.xlu0 %v383_v30, 256 }
 0x2f1   :  { %v256_v31 = vpop.xlane.xlu0 %255 }
 0x2f5   :  { %v267_v33 = vpop.permute.xlu0 %266 }
 0x2f6   :  { %v269_v34 = vadd.f32 %v267_v33, %v256_v31 }
 0x2f8   :  { %v259_v35 = vpop.xlane.xlu1 %258  ;;  %274 = vperm.xlu1 %393, %v269_v34  }
 0x2f9   :  { %v270_v36 = vadd.f32 %v267_v33, %v259_v35 }
 0x2fb   :  { %277 = vperm.xlu0 %392, %v270_v36  }
 0x377   :  { %v275_v37 = vpop.permute.xlu1 %274 }
 0x378   :  { %v282_v39 = vrot.slane %v275_v37, %v509_v32 }
 0x37a   :  { %v278_v38 = vpop.permute.xlu0 %277 }
 0x37b   :  { %v286_v40 = vrot.slane %v278_v38, %v509_v32 }
 0x37d   :  { %v287_v41 = vsel %vm124_vm1, %v286_v40, %v282_v39 }
 0x37e   :  { %v289_v42 = vsel %vm129_vm2, %v287_v41, -inf }
 0x37f   :  { %290 = vmax.xlane.f32.xlu1 %v289_v42 }
 0x40c   :  { %v291_v43 = vpop.xlane.xlu1 %290 }
 0x40d   :  { %v296_v44 = vrot.slane %v291_v43, %v498_v3  ;;  %v300_v45 = vrot.slane %v291_v43, %v501_v4 }
 0x40f   :  { %v303_v46 = vsub.f32 %v269_v34, %v296_v44  ;;  %v304_v47 = vsub.f32 %v270_v36, %v300_v45 }
 0x411   :  { %v305_v48 = vmul.f32 1.442695, %v303_v46  ;;  %v307_v49 = vmul.f32 1.442695, %v304_v47 }
 0x413   :  { %394 = vpow2.f32 %v305_v48 }
 0x414   :  { %396 = vpow2.f32 %v307_v49 }
 0x41d   :  { %v395_v50 = vpop.eup %394 }
 0x41e   :  { %312 = vperm.xlu0 %392, %v395_v50   ;;  %v397_v51 = vpop.eup %396 }
 0x422   :  { %315 = vperm.xlu0 %392, %v397_v51  }
 0x49d   :  { %v313_v52 = vpop.permute.xlu0 %312 }
 0x49e   :  { %v320_v54 = vrot.slane %v313_v52, %v509_v32 }
 0x4a1   :  { %v316_v53 = vpop.permute.xlu0 %315 }
 0x4a2   :  { %v324_v55 = vrot.slane %v316_v53, %v509_v32 }
 0x4a4   :  { %v325_v56 = vsel %vm124_vm1, %v324_v55, %v320_v54 }
 0x4a5   :  { %v327_v57 = vsel %vm129_vm2, %v325_v56, 0.0 }
 0x4a6   :  { %328 = vadd.xlane.f32.xlu0 %v327_v57 }
 0x533   :  { %v329_v58 = vpop.xlane.xlu0 %328 }
 0x534   :  { %v334_v59 = vrot.slane %v329_v58, %v498_v3  ;;  %v338_v60 = vrot.slane %v329_v58, %v501_v4 }
 0x536   :  { %398 = vrcp.f32 %v334_v59 }
 0x537   :  { %400 = vrcp.f32 %v338_v60 }
 0x540   :  { %v399_v61 = vpop.eup %398 }
 0x541   :  { %v401_v62 = vpop.eup %400  ;;  %v342_v63 = vmul.f32 %v399_v61, %v395_v50 }
 0x542   :  { %v344_v0 = vmul.f32 %v401_v62, %v397_v51 }
 0x543   :  { %348 = vperm.xlu1 %393, %v342_v63  }
 0x544   :  { %351 = vperm.xlu0 %392, %v344_v0  }
 0x5c2   :  { %v349_v1 = vpop.permute.xlu1 %348 }
 0x5c3   :  { %v352_v2 = vpop.permute.xlu0 %351  ;;  %v356_v5 = vrot.slane %v349_v1, %v509_v32 }
 0x5c4   :  { %v360_v3 = vrot.slane %v352_v2, %v509_v32 }
 0x5c5   :  { %364 = vst.msk [vmem:[#allocation6] sm:$0x1] %vm363_vm6, %v356_v5 }
 0x5c6   :  { %365 = vst.msk [vmem:[#allocation6 + $0x1] sm:$0x1] %vm363_vm6, %v360_v3 }
 0x5c7   :  { %435 = shalt.err (!%p432_p12)
}
 0x5c8   :  { %s436_s10 = scalar_lea.hbm %s573_s4, 32 }
 0x5c9   :  { %p437_p13 = scmp.ne.s32.totalorder %s573_s4, %s436_s10  ;;  %p440_p0 = scmp.lt.u32.totalorder %s436_s10, %s573_s4 }
 0x5cb   :  { %p442_p1 = pnand %p440_p0, %p437_p13 }
 0x5cd   :  { %445 = shalt.err (!%p442_p1)
}
 0x5ce   :  { %s456_s15 = smov 16   ;;  %s457_s16 = smov 1  }
 0x5cf   :  { %377 = dma.vmem_to_hbm [thread:$0]  %s372_s6, 32, %s573_s4, [#allocation5], %s456_s15, %s456_s15, %s457_s16  }
 0x5d0   :  { %448 = dma.done.wait [#allocation5], 32  }
 0x5d1   :  { %449 = vsyncadd [#allocation5], 4294967264 }
 0x5d2   :  { %381 = vsyncpa [#allocation4], 1 }
 0x5d3   :  { %382 = vsyncpa [#allocation5], 1 }

</bundles_post_ra>
